<compile_context>
chip_gen: v7x
topology: tpu7x:2x2x1
jax: 0.10.0
libtpu: 0.0.40
codegen_flags: <defaults>
</compile_context>

<pallas_src>
import math
import functools

import jax
import jax.numpy as jnp
from jax.experimental import pallas as pl
from jax.experimental.pallas import tpu as pltpu


def _self_attention_kernel(q_ref, k_ref, v_ref,
                           wq_ref, wk_ref, wv_ref,
                           wo_ref, bo_ref,
                           o_ref,
                           q_sc, k_sc, v_sc, ctx_sc,
                           *, heads, d_k, block_batch, seq):
    rows, dim = q_ref.shape              # rows = block_batch * seq
    Bt, S = block_batch, seq
    cdtype = q_sc.dtype                  # compute dtype (input dtype or bf16)

    # Input projections on a tall [rows, dim] slab; f32 accumulation on MXU.
    # (1/sqrt(d_k) is already folded into wq on the host.)  Results are staged
    # in VMEM scratch so they don't stay live in vregs across the head loop.
    q_sc[...] = jnp.dot(q_ref[...], wq_ref[...],
                        preferred_element_type=jnp.float32
                        ).astype(cdtype).reshape(Bt, S, dim)
    k_sc[...] = jnp.dot(k_ref[...], wk_ref[...],
                        preferred_element_type=jnp.float32
                        ).astype(cdtype).reshape(Bt, S, dim)
    v_sc[...] = jnp.dot(v_ref[...], wv_ref[...],
                        preferred_element_type=jnp.float32
                        ).astype(cdtype).reshape(Bt, S, dim)

    # Static head loop: lane slices of the scratch refs, no transposes.
    # Each head writes its context into the concat scratch at lane offset lo,
    # producing the natural head-concat layout for a single Wo matmul.
    for h in range(heads):
        lo = h * d_k
        qh = q_sc[:, :, lo:lo + d_k]     # [Bt, S, d_k]
        kh = k_sc[:, :, lo:lo + d_k]
        vh = v_sc[:, :, lo:lo + d_k]

        # Scores (scale already folded into Wq); softmax math kept in f32.
        s = jnp.einsum('bqd,bkd->bqk', qh, kh,
                       preferred_element_type=jnp.float32)     # [Bt, S, S]
        m = jnp.max(s, axis=-1, keepdims=True)
        p = jnp.exp(s - m)                                     # unnormalized, <= 1
        l = jnp.sum(p, axis=-1, keepdims=True)                 # [Bt, S, 1]

        ctx = jnp.einsum('bqk,bkd->bqd', p.astype(cdtype), vh,
                         preferred_element_type=jnp.float32)   # [Bt, S, d_k]
        # Deferred normalization: scale ctx (S/d_k fewer multiplies than p).
        ctx = ctx * pl.reciprocal(l, approx=False)
        ctx_sc[:, :, lo:lo + d_k] = ctx.astype(cdtype)

    # Single output projection with full K = dim contraction, then bias.
    ctx_all = ctx_sc[...].reshape(rows, dim)
    out = jnp.dot(ctx_all, wo_ref[...], preferred_element_type=jnp.float32)
    out = out + bo_ref[...].astype(jnp.float32)                # [rows, dim]
    o_ref[...] = out.astype(o_ref.dtype)


def simple_self_attention(q, k, v, params, heads, *, block_batch=None,
                          compute_dtype=None, mask=None):
    """params: PyTorch-convention weights:
         'wq','wk','wv','wo' of shape [dim, dim] (Linear weight, y = x @ W.T),
         'bo' of shape [dim].
       compute_dtype: optional (e.g. jnp.bfloat16) to run the matmuls at
         reduced precision with f32 accumulation (accuracy-gated).
    """
    assert mask is None  # TODO(synk): masked attention path not implemented.
    B, S, dim = q.shape
    assert dim % heads == 0
    d_k = dim // heads

    in_dtype = jnp.dtype(q.dtype)
    cdtype = jnp.dtype(compute_dtype) if compute_dtype is not None else in_dtype

    # --- VMEM-budget-aware tile sizing -------------------------------------
    try:
        vmem_cap = int(pltpu.get_tpu_info().vmem_capacity_bytes)
    except Exception:
        vmem_cap = 64 * 1024 * 1024                      # assume smallest (v7x)
    vmem_budget = int(vmem_cap * 0.70)
    vmem_limit = int(min(max(vmem_budget, 32 * 1024 * 1024), 96 * 1024 * 1024))

    io_itm = in_dtype.itemsize
    c_itm = cdtype.itemsize

    def step_vmem(bt):
        rows = bt * S
        b = 0
        b += 2 * 3 * rows * dim * io_itm                 # q/k/v blocks (2 bufs)
        b += 2 * rows * dim * io_itm                     # output block (2 bufs)
        b += 2 * (4 * dim * dim + dim) * max(c_itm, io_itm)  # resident weights
        b += 4 * rows * dim * c_itm                      # Q/K/V/ctx scratch
        b += 3 * bt * S * S * 4                          # f32 score/p temporaries
        return b

    if block_batch is None:
        # Tall-slab target scaled by generation (bigger on 128 MiB chips),
        # but never collapse the grid to 1 step when B > 1 (v7x has 2 TCs).
        target_rows = 2048 if vmem_cap > 96 * 1024 * 1024 else 1024
        bt = max(1, min(B, target_rows // max(S, 1)))
        if B > 1:
            bt = min(bt, B // 2)
        bt = max(bt, 1)
        while bt > 1 and (B % bt != 0 or step_vmem(bt) > vmem_budget):
            bt -= 1
        block_batch = bt
    Bt = block_batch
    assert B % Bt == 0, "block_batch must divide the batch"
    rows_blk = Bt * S
    # BlockSpec sublane rule: second-to-last block dim must be a multiple of 8
    # or equal the full extent; fall back to a single full block otherwise.
    if rows_blk % 8 != 0 and rows_blk != B * S:
        Bt = B
        rows_blk = B * S

    # --- Host-side weight prep ----------------------------------------------
    # Pre-transpose so the kernel does y = x @ W; fold 1/sqrt(d_k) into Wq.
    scale = 1.0 / math.sqrt(d_k)
    wq_t = (params["wq"].T * scale).astype(cdtype)
    wk_t = params["wk"].T.astype(cdtype)
    wv_t = params["wv"].T.astype(cdtype)
    wo_t = params["wo"].T.astype(cdtype)
    bo2 = params["bo"].reshape(1, dim)                    # bias stays full precision

    # Flatten (B, S) -> rows on the host (free reshape) so the kernel sees
    # 2-D sublane-dense slabs.
    q2 = q.reshape(B * S, dim).astype(cdtype)
    k2 = k.reshape(B * S, dim).astype(cdtype)
    v2 = v.reshape(B * S, dim).astype(cdtype)

    kernel = functools.partial(_self_attention_kernel,
                               heads=heads, d_k=d_k,
                               block_batch=Bt, seq=S)

    # Advisory cost estimate for XLA's scheduler (includes the output write).
    flops = 2 * 4 * B * S * dim * dim + 2 * 2 * B * heads * S * S * d_k
    transcendentals = B * heads * S * S
    bytes_accessed = (c_itm * 3 * B * S * dim                  # q/k/v reads
                      + io_itm * B * S * dim                   # output write
                      + c_itm * 4 * dim * dim                  # weights
                      + bo2.dtype.itemsize * dim)              # bias

    out_flat = pl.pallas_call(
        kernel,
        out_shape=jax.ShapeDtypeStruct((B * S, dim), in_dtype),
        grid=(B // Bt,),
        in_specs=[
            pl.BlockSpec((rows_blk, dim), lambda b: (b, 0)),   # q rows
            pl.BlockSpec((rows_blk, dim), lambda b: (b, 0)),   # k rows
            pl.BlockSpec((rows_blk, dim), lambda b: (b, 0)),   # v rows
            # Constant index_maps -> weight blocks stay resident (no re-DMA).
            pl.BlockSpec((dim, dim), lambda b: (0, 0)),        # wq^T * scale
            pl.BlockSpec((dim, dim), lambda b: (0, 0)),        # wk^T
            pl.BlockSpec((dim, dim), lambda b: (0, 0)),        # wv^T
            pl.BlockSpec((dim, dim), lambda b: (0, 0)),        # wo^T
            pl.BlockSpec((1, dim), lambda b: (0, 0)),          # bo
        ],
        out_specs=pl.BlockSpec((rows_blk, dim), lambda b: (b, 0)),
        scratch_shapes=[
            pltpu.VMEM((Bt, S, dim), cdtype),                  # Q projected
            pltpu.VMEM((Bt, S, dim), cdtype),                  # K projected
            pltpu.VMEM((Bt, S, dim), cdtype),                  # V projected
            pltpu.VMEM((Bt, S, dim), cdtype),                  # ctx concat buffer
        ],
        compiler_params=pltpu.CompilerParams(
            dimension_semantics=("parallel",),
            vmem_limit_bytes=vmem_limit),
        cost_estimate=pl.CostEstimate(
            flops=flops,
            transcendentals=transcendentals,
            bytes_accessed=bytes_accessed),
    )(q2, k2, v2, wq_t, wk_t, wv_t, wo_t, bo2)

    return out_flat.reshape(B, S, dim)


def _reference(q, k, v, params, heads):
    """Pure-JAX reference mirroring the PyTorch forward (dropout = identity)."""
    B, S, dim = q.shape
    d_k = dim // heads
    Q = q @ params["wq"].T
    K = k @ params["wk"].T
    V = v @ params["wv"].T
    Qh = Q.reshape(B, S, heads, d_k).transpose(0, 2, 1, 3)
    Kh = K.reshape(B, S, heads, d_k).transpose(0, 2, 1, 3)
    Vh = V.reshape(B, S, heads, d_k).transpose(0, 2, 1, 3)
    scores = jnp.einsum('bhqd,bhkd->bhqk', Qh, Kh) / math.sqrt(d_k)
    p = jax.nn.softmax(scores, axis=-1)
    ctx = jnp.einsum('bhqk,bhkd->bhqd', p, Vh)
    ctx = ctx.transpose(0, 2, 1, 3).reshape(B, S, dim)
    return ctx @ params["wo"].T + params["bo"]


if __name__ == "__main__":
    B, S, dim, heads = 2, 8, 32, 4

    key = jax.random.PRNGKey(0)
    kq, kk, kv, kwq, kwk, kwv, kwo, kbo = jax.random.split(key, 8)

    q = jax.random.normal(kq, (B, S, dim), dtype=jnp.float32)
    k = jax.random.normal(kk, (B, S, dim), dtype=jnp.float32)
    v = jax.random.normal(kv, (B, S, dim), dtype=jnp.float32)

    # Deterministic parameter init (PyTorch Linear weight shape [out, in]).
    scale = 1.0 / math.sqrt(dim)
    params = {
        "wq": jax.random.uniform(kwq, (dim, dim), jnp.float32, -scale, scale),
        "wk": jax.random.uniform(kwk, (dim, dim), jnp.float32, -scale, scale),
        "wv": jax.random.uniform(kwv, (dim, dim), jnp.float32, -scale, scale),
        "wo": jax.random.uniform(kwo, (dim, dim), jnp.float32, -scale, scale),
        "bo": jax.random.uniform(kbo, (dim,), jnp.float32, -scale, scale),
    }

    out = simple_self_attention(q, k, v, params, heads)
    out = jax.block_until_ready(out)

    ref = _reference(q, k, v, params, heads)
    assert out.shape == (B, S, dim)
    assert jnp.allclose(out, ref, atol=1e-4, rtol=1e-4), (
        f"max abs diff {jnp.max(jnp.abs(out - ref))}")

    print("KERNEL_OK")
</pallas_src>

<mosaic_0001>
module attributes {stable_mosaic.version = 11 : i64} {
  func.func @_self_attention_kernel(%arg0: i32, %arg1: memref<8x32xf32, #tpu.memory_space<vmem>>, %arg2: memref<8x32xf32, #tpu.memory_space<vmem>>, %arg3: memref<8x32xf32, #tpu.memory_space<vmem>>, %arg4: memref<32x32xf32, #tpu.memory_space<vmem>>, %arg5: memref<32x32xf32, #tpu.memory_space<vmem>>, %arg6: memref<32x32xf32, #tpu.memory_space<vmem>>, %arg7: memref<32x32xf32, #tpu.memory_space<vmem>>, %arg8: memref<1x32xf32, #tpu.memory_space<vmem>>, %arg9: memref<8x32xf32, #tpu.memory_space<vmem>>, %arg10: memref<1x8x32xf32, #tpu.memory_space<vmem>>, %arg11: memref<1x8x32xf32, #tpu.memory_space<vmem>>, %arg12: memref<1x8x32xf32, #tpu.memory_space<vmem>>, %arg13: memref<1x8x32xf32, #tpu.memory_space<vmem>>) attributes {dimension_semantics = [#tpu.dimension_semantics<parallel>], iteration_bounds = array<i64: 2>, scalar_prefetch = 0 : i64, scratch_operands = 4 : i64, tpu.core_type = #tpu.core_type<tc>, window_params = [{transform_indices = @transform_0, window_bounds = array<i64: 8, 32>}, {transform_indices = @transform_1, window_bounds = array<i64: 8, 32>}, {transform_indices = @transform_2, window_bounds = array<i64: 8, 32>}, {pipeline_mode = #tpu.pipeline_mode<synchronous>, transform_indices = @transform_3, window_bounds = array<i64: 32, 32>}, {pipeline_mode = #tpu.pipeline_mode<synchronous>, transform_indices = @transform_4, window_bounds = array<i64: 32, 32>}, {pipeline_mode = #tpu.pipeline_mode<synchronous>, transform_indices = @transform_5, window_bounds = array<i64: 32, 32>}, {pipeline_mode = #tpu.pipeline_mode<synchronous>, transform_indices = @transform_6, window_bounds = array<i64: 32, 32>}, {pipeline_mode = #tpu.pipeline_mode<synchronous>, transform_indices = @transform_7, window_bounds = array<i64: 1, 32>}, {transform_indices = @transform_8, window_bounds = array<i64: 8, 32>}]} {
    %c0 = arith.constant 0 : index
    %c0_0 = arith.constant 0 : index
    %0 = vector.load %arg1[%c0, %c0_0] : memref<8x32xf32, #tpu.memory_space<vmem>>, vector<8x32xf32>
    %c0_1 = arith.constant 0 : index
    %c0_2 = arith.constant 0 : index
    %1 = vector.load %arg4[%c0_1, %c0_2] : memref<32x32xf32, #tpu.memory_space<vmem>>, vector<32x32xf32>
    %cst = arith.constant dense<0.000000e+00> : vector<8x32xf32>
    %2 = tpu.matmul %0, %1, %cst {dimension_numbers = #tpu.dot_dimension_numbers<[1], [0], [0], [1], [0, 0, 1, 1], [], []>} : vector<8x32xf32>, vector<32x32xf32>, vector<8x32xf32> -> vector<8x32xf32>
    %3 = vector.shape_cast %2 : vector<8x32xf32> to vector<1x8x32xf32>
    %c0_3 = arith.constant 0 : index
    %c0_4 = arith.constant 0 : index
    %c0_5 = arith.constant 0 : index
    %4 = vector.load %arg10[%c0_3, %c0_4, %c0_5] : memref<1x8x32xf32, #tpu.memory_space<vmem>>, vector<1x8x32xf32>
    tpu.vector_store %arg10[%c0_3, %c0_4, %c0_5], %3 {strides = array<i32>} : memref<1x8x32xf32, #tpu.memory_space<vmem>>, vector<1x8x32xf32>,
    %c0_6 = arith.constant 0 : index
    %c0_7 = arith.constant 0 : index
    %5 = vector.load %arg2[%c0_6, %c0_7] : memref<8x32xf32, #tpu.memory_space<vmem>>, vector<8x32xf32>
    %c0_8 = arith.constant 0 : index
    %c0_9 = arith.constant 0 : index
    %6 = vector.load %arg5[%c0_8, %c0_9] : memref<32x32xf32, #tpu.memory_space<vmem>>, vector<32x32xf32>
    %cst_10 = arith.constant dense<0.000000e+00> : vector<8x32xf32>
    %7 = tpu.matmul %5, %6, %cst_10 {dimension_numbers = #tpu.dot_dimension_numbers<[1], [0], [0], [1], [0, 0, 1, 1], [], []>} : vector<8x32xf32>, vector<32x32xf32>, vector<8x32xf32> -> vector<8x32xf32>
    %8 = vector.shape_cast %7 : vector<8x32xf32> to vector<1x8x32xf32>
    %c0_11 = arith.constant 0 : index
    %c0_12 = arith.constant 0 : index
    %c0_13 = arith.constant 0 : index
    %9 = vector.load %arg11[%c0_11, %c0_12, %c0_13] : memref<1x8x32xf32, #tpu.memory_space<vmem>>, vector<1x8x32xf32>
    tpu.vector_store %arg11[%c0_11, %c0_12, %c0_13], %8 {strides = array<i32>} : memref<1x8x32xf32, #tpu.memory_space<vmem>>, vector<1x8x32xf32>,
    %c0_14 = arith.constant 0 : index
    %c0_15 = arith.constant 0 : index
    %10 = vector.load %arg3[%c0_14, %c0_15] : memref<8x32xf32, #tpu.memory_space<vmem>>, vector<8x32xf32>
    %c0_16 = arith.constant 0 : index
    %c0_17 = arith.constant 0 : index
    %11 = vector.load %arg6[%c0_16, %c0_17] : memref<32x32xf32, #tpu.memory_space<vmem>>, vector<32x32xf32>
    %cst_18 = arith.constant dense<0.000000e+00> : vector<8x32xf32>
    %12 = tpu.matmul %10, %11, %cst_18 {dimension_numbers = #tpu.dot_dimension_numbers<[1], [0], [0], [1], [0, 0, 1, 1], [], []>} : vector<8x32xf32>, vector<32x32xf32>, vector<8x32xf32> -> vector<8x32xf32>
    %13 = vector.shape_cast %12 : vector<8x32xf32> to vector<1x8x32xf32>
    %c0_19 = arith.constant 0 : index
    %c0_20 = arith.constant 0 : index
    %c0_21 = arith.constant 0 : index
    %14 = vector.load %arg12[%c0_19, %c0_20, %c0_21] : memref<1x8x32xf32, #tpu.memory_space<vmem>>, vector<1x8x32xf32>
    tpu.vector_store %arg12[%c0_19, %c0_20, %c0_21], %13 {strides = array<i32>} : memref<1x8x32xf32, #tpu.memory_space<vmem>>, vector<1x8x32xf32>,
    %c0_22 = arith.constant 0 : index
    %c0_23 = arith.constant 0 : index
    %c0_24 = arith.constant 0 : index
    %15 = vector.load %arg10[%c0_22, %c0_23, %c0_24] : memref<1x8x32xf32, #tpu.memory_space<vmem>>, vector<1x8x8xf32>
    %c0_25 = arith.constant 0 : index
    %c0_26 = arith.constant 0 : index
    %c0_27 = arith.constant 0 : index
    %16 = vector.load %arg11[%c0_25, %c0_26, %c0_27] : memref<1x8x32xf32, #tpu.memory_space<vmem>>, vector<1x8x8xf32>
    %c0_28 = arith.constant 0 : index
    %c0_29 = arith.constant 0 : index
    %c0_30 = arith.constant 0 : index
    %17 = vector.load %arg12[%c0_28, %c0_29, %c0_30] : memref<1x8x32xf32, #tpu.memory_space<vmem>>, vector<1x8x8xf32>
    "tpu.trace_start"() <{level = 10 : i32, message = "bqd,bkd->bqk"}> : () -> ()
    %cst_31 = arith.constant dense<0.000000e+00> : vector<1x8x8xf32>
    %18 = tpu.matmul %15, %16, %cst_31 {dimension_numbers = #tpu.dot_dimension_numbers<[2], [2], [1], [1], [0, 0, 0, 1, 1, 1], [0], [0]>} : vector<1x8x8xf32>, vector<1x8x8xf32>, vector<1x8x8xf32> -> vector<1x8x8xf32>
    "tpu.trace_stop"() : () -> ()
    %cst_32 = arith.constant dense<0xFF800000> : vector<1x8xf32>
    %19 = vector.multi_reduction <maximumf>, %18, %cst_32 [2] : vector<1x8x8xf32> to vector<1x8xf32>
    %20 = vector.shape_cast %19 : vector<1x8xf32> to vector<1x8x1xf32>
    %21 = vector.broadcast %20 : vector<1x8x1xf32> to vector<1x8x8xf32>
    %22 = arith.subf %18, %21 : vector<1x8x8xf32>
    %23 = math.exp %22 : vector<1x8x8xf32>
    %cst_33 = arith.constant dense<0.000000e+00> : vector<1x8xf32>
    %24 = vector.multi_reduction <add>, %23, %cst_33 [2] : vector<1x8x8xf32> to vector<1x8xf32>
    %25 = vector.shape_cast %24 : vector<1x8xf32> to vector<1x8x1xf32>
    "tpu.trace_start"() <{level = 10 : i32, message = "bqk,bkd->bqd"}> : () -> ()
    %cst_34 = arith.constant dense<0.000000e+00> : vector<1x8x8xf32>
    %26 = tpu.matmul %23, %17, %cst_34 {dimension_numbers = #tpu.dot_dimension_numbers<[2], [1], [1], [2], [0, 0, 0, 1, 1, 2], [0], [0]>} : vector<1x8x8xf32>, vector<1x8x8xf32>, vector<1x8x8xf32> -> vector<1x8x8xf32>
    "tpu.trace_stop"() : () -> ()
    %27 = tpu.reciprocal %25 : vector<1x8x1xf32> -> vector<1x8x1xf32>
    %28 = vector.broadcast %27 : vector<1x8x1xf32> to vector<1x8x8xf32>
    %29 = arith.mulf %26, %28 : vector<1x8x8xf32>
    %c0_35 = arith.constant 0 : index
    %c0_36 = arith.constant 0 : index
    %c0_37 = arith.constant 0 : index
    %30 = vector.load %arg13[%c0_35, %c0_36, %c0_37] : memref<1x8x32xf32, #tpu.memory_space<vmem>>, vector<1x8x8xf32>
    tpu.vector_store %arg13[%c0_35, %c0_36, %c0_37], %29 {strides = array<i32>} : memref<1x8x32xf32, #tpu.memory_space<vmem>>, vector<1x8x8xf32>,
    %c0_38 = arith.constant 0 : index
    %c0_39 = arith.constant 0 : index
    %c8 = arith.constant 8 : index
    %31 = vector.load %arg10[%c0_38, %c0_39, %c8] : memref<1x8x32xf32, #tpu.memory_space<vmem>>, vector<1x8x8xf32>
    %c0_40 = arith.constant 0 : index
    %c0_41 = arith.constant 0 : index
    %c8_42 = arith.constant 8 : index
    %32 = vector.load %arg11[%c0_40, %c0_41, %c8_42] : memref<1x8x32xf32, #tpu.memory_space<vmem>>, vector<1x8x8xf32>
    %c0_43 = arith.constant 0 : index
    %c0_44 = arith.constant 0 : index
    %c8_45 = arith.constant 8 : index
    %33 = vector.load %arg12[%c0_43, %c0_44, %c8_45] : memref<1x8x32xf32, #tpu.memory_space<vmem>>, vector<1x8x8xf32>
    "tpu.trace_start"() <{level = 10 : i32, message = "bqd,bkd->bqk"}> : () -> ()
    %cst_46 = arith.constant dense<0.000000e+00> : vector<1x8x8xf32>
    %34 = tpu.matmul %31, %32, %cst_46 {dimension_numbers = #tpu.dot_dimension_numbers<[2], [2], [1], [1], [0, 0, 0, 1, 1, 1], [0], [0]>} : vector<1x8x8xf32>, vector<1x8x8xf32>, vector<1x8x8xf32> -> vector<1x8x8xf32>
    "tpu.trace_stop"() : () -> ()
    %cst_47 = arith.constant dense<0xFF800000> : vector<1x8xf32>
    %35 = vector.multi_reduction <maximumf>, %34, %cst_47 [2] : vector<1x8x8xf32> to vector<1x8xf32>
    %36 = vector.shape_cast %35 : vector<1x8xf32> to vector<1x8x1xf32>
    %37 = vector.broadcast %36 : vector<1x8x1xf32> to vector<1x8x8xf32>
    %38 = arith.subf %34, %37 : vector<1x8x8xf32>
    %39 = math.exp %38 : vector<1x8x8xf32>
    %cst_48 = arith.constant dense<0.000000e+00> : vector<1x8xf32>
    %40 = vector.multi_reduction <add>, %39, %cst_48 [2] : vector<1x8x8xf32> to vector<1x8xf32>
    %41 = vector.shape_cast %40 : vector<1x8xf32> to vector<1x8x1xf32>
    "tpu.trace_start"() <{level = 10 : i32, message = "bqk,bkd->bqd"}> : () -> ()
    %cst_49 = arith.constant dense<0.000000e+00> : vector<1x8x8xf32>
    %42 = tpu.matmul %39, %33, %cst_49 {dimension_numbers = #tpu.dot_dimension_numbers<[2], [1], [1], [2], [0, 0, 0, 1, 1, 2], [0], [0]>} : vector<1x8x8xf32>, vector<1x8x8xf32>, vector<1x8x8xf32> -> vector<1x8x8xf32>
    "tpu.trace_stop"() : () -> ()
    %43 = tpu.reciprocal %41 : vector<1x8x1xf32> -> vector<1x8x1xf32>
    %44 = vector.broadcast %43 : vector<1x8x1xf32> to vector<1x8x8xf32>
    %45 = arith.mulf %42, %44 : vector<1x8x8xf32>
    %c0_50 = arith.constant 0 : index
    %c0_51 = arith.constant 0 : index
    %c8_52 = arith.constant 8 : index
    %46 = vector.load %arg13[%c0_50, %c0_51, %c8_52] : memref<1x8x32xf32, #tpu.memory_space<vmem>>, vector<1x8x8xf32>
    tpu.vector_store %arg13[%c0_50, %c0_51, %c8_52], %45 {strides = array<i32>} : memref<1x8x32xf32, #tpu.memory_space<vmem>>, vector<1x8x8xf32>,
    %c0_53 = arith.constant 0 : index
    %c0_54 = arith.constant 0 : index
    %c16 = arith.constant 16 : index
    %47 = vector.load %arg10[%c0_53, %c0_54, %c16] : memref<1x8x32xf32, #tpu.memory_space<vmem>>, vector<1x8x8xf32>
    %c0_55 = arith.constant 0 : index
    %c0_56 = arith.constant 0 : index
    %c16_57 = arith.constant 16 : index
    %48 = vector.load %arg11[%c0_55, %c0_56, %c16_57] : memref<1x8x32xf32, #tpu.memory_space<vmem>>, vector<1x8x8xf32>
    %c0_58 = arith.constant 0 : index
    %c0_59 = arith.constant 0 : index
    %c16_60 = arith.constant 16 : index
    %49 = vector.load %arg12[%c0_58, %c0_59, %c16_60] : memref<1x8x32xf32, #tpu.memory_space<vmem>>, vector<1x8x8xf32>
    "tpu.trace_start"() <{level = 10 : i32, message = "bqd,bkd->bqk"}> : () -> ()
    %cst_61 = arith.constant dense<0.000000e+00> : vector<1x8x8xf32>
    %50 = tpu.matmul %47, %48, %cst_61 {dimension_numbers = #tpu.dot_dimension_numbers<[2], [2], [1], [1], [0, 0, 0, 1, 1, 1], [0], [0]>} : vector<1x8x8xf32>, vector<1x8x8xf32>, vector<1x8x8xf32> -> vector<1x8x8xf32>
    "tpu.trace_stop"() : () -> ()
    %cst_62 = arith.constant dense<0xFF800000> : vector<1x8xf32>
    %51 = vector.multi_reduction <maximumf>, %50, %cst_62 [2] : vector<1x8x8xf32> to vector<1x8xf32>
    %52 = vector.shape_cast %51 : vector<1x8xf32> to vector<1x8x1xf32>
    %53 = vector.broadcast %52 : vector<1x8x1xf32> to vector<1x8x8xf32>
    %54 = arith.subf %50, %53 : vector<1x8x8xf32>
    %55 = math.exp %54 : vector<1x8x8xf32>
    %cst_63 = arith.constant dense<0.000000e+00> : vector<1x8xf32>
    %56 = vector.multi_reduction <add>, %55, %cst_63 [2] : vector<1x8x8xf32> to vector<1x8xf32>
    %57 = vector.shape_cast %56 : vector<1x8xf32> to vector<1x8x1xf32>
    "tpu.trace_start"() <{level = 10 : i32, message = "bqk,bkd->bqd"}> : () -> ()
    %cst_64 = arith.constant dense<0.000000e+00> : vector<1x8x8xf32>
    %58 = tpu.matmul %55, %49, %cst_64 {dimension_numbers = #tpu.dot_dimension_numbers<[2], [1], [1], [2], [0, 0, 0, 1, 1, 2], [0], [0]>} : vector<1x8x8xf32>, vector<1x8x8xf32>, vector<1x8x8xf32> -> vector<1x8x8xf32>
    "tpu.trace_stop"() : () -> ()
    %59 = tpu.reciprocal %57 : vector<1x8x1xf32> -> vector<1x8x1xf32>
    %60 = vector.broadcast %59 : vector<1x8x1xf32> to vector<1x8x8xf32>
    %61 = arith.mulf %58, %60 : vector<1x8x8xf32>
    %c0_65 = arith.constant 0 : index
    %c0_66 = arith.constant 0 : index
    %c16_67 = arith.constant 16 : index
    %62 = vector.load %arg13[%c0_65, %c0_66, %c16_67] : memref<1x8x32xf32, #tpu.memory_space<vmem>>, vector<1x8x8xf32>
    tpu.vector_store %arg13[%c0_65, %c0_66, %c16_67], %61 {strides = array<i32>} : memref<1x8x32xf32, #tpu.memory_space<vmem>>, vector<1x8x8xf32>,
    %c0_68 = arith.constant 0 : index
    %c0_69 = arith.constant 0 : index
    %c24 = arith.constant 24 : index
    %63 = vector.load %arg10[%c0_68, %c0_69, %c24] : memref<1x8x32xf32, #tpu.memory_space<vmem>>, vector<1x8x8xf32>
    %c0_70 = arith.constant 0 : index
    %c0_71 = arith.constant 0 : index
    %c24_72 = arith.constant 24 : index
    %64 = vector.load %arg11[%c0_70, %c0_71, %c24_72] : memref<1x8x32xf32, #tpu.memory_space<vmem>>, vector<1x8x8xf32>
    %c0_73 = arith.constant 0 : index
    %c0_74 = arith.constant 0 : index
    %c24_75 = arith.constant 24 : index
    %65 = vector.load %arg12[%c0_73, %c0_74, %c24_75] : memref<1x8x32xf32, #tpu.memory_space<vmem>>, vector<1x8x8xf32>
    "tpu.trace_start"() <{level = 10 : i32, message = "bqd,bkd->bqk"}> : () -> ()
    %cst_76 = arith.constant dense<0.000000e+00> : vector<1x8x8xf32>
    %66 = tpu.matmul %63, %64, %cst_76 {dimension_numbers = #tpu.dot_dimension_numbers<[2], [2], [1], [1], [0, 0, 0, 1, 1, 1], [0], [0]>} : vector<1x8x8xf32>, vector<1x8x8xf32>, vector<1x8x8xf32> -> vector<1x8x8xf32>
    "tpu.trace_stop"() : () -> ()
    %cst_77 = arith.constant dense<0xFF800000> : vector<1x8xf32>
    %67 = vector.multi_reduction <maximumf>, %66, %cst_77 [2] : vector<1x8x8xf32> to vector<1x8xf32>
    %68 = vector.shape_cast %67 : vector<1x8xf32> to vector<1x8x1xf32>
    %69 = vector.broadcast %68 : vector<1x8x1xf32> to vector<1x8x8xf32>
    %70 = arith.subf %66, %69 : vector<1x8x8xf32>
    %71 = math.exp %70 : vector<1x8x8xf32>
    %cst_78 = arith.constant dense<0.000000e+00> : vector<1x8xf32>
    %72 = vector.multi_reduction <add>, %71, %cst_78 [2] : vector<1x8x8xf32> to vector<1x8xf32>
    %73 = vector.shape_cast %72 : vector<1x8xf32> to vector<1x8x1xf32>
    "tpu.trace_start"() <{level = 10 : i32, message = "bqk,bkd->bqd"}> : () -> ()
    %cst_79 = arith.constant dense<0.000000e+00> : vector<1x8x8xf32>
    %74 = tpu.matmul %71, %65, %cst_79 {dimension_numbers = #tpu.dot_dimension_numbers<[2], [1], [1], [2], [0, 0, 0, 1, 1, 2], [0], [0]>} : vector<1x8x8xf32>, vector<1x8x8xf32>, vector<1x8x8xf32> -> vector<1x8x8xf32>
    "tpu.trace_stop"() : () -> ()
    %75 = tpu.reciprocal %73 : vector<1x8x1xf32> -> vector<1x8x1xf32>
    %76 = vector.broadcast %75 : vector<1x8x1xf32> to vector<1x8x8xf32>
    %77 = arith.mulf %74, %76 : vector<1x8x8xf32>
    %c0_80 = arith.constant 0 : index
    %c0_81 = arith.constant 0 : index
    %c24_82 = arith.constant 24 : index
    %78 = vector.load %arg13[%c0_80, %c0_81, %c24_82] : memref<1x8x32xf32, #tpu.memory_space<vmem>>, vector<1x8x8xf32>
    tpu.vector_store %arg13[%c0_80, %c0_81, %c24_82], %77 {strides = array<i32>} : memref<1x8x32xf32, #tpu.memory_space<vmem>>, vector<1x8x8xf32>,
    %c0_83 = arith.constant 0 : index
    %c0_84 = arith.constant 0 : index
    %c0_85 = arith.constant 0 : index
    %79 = vector.load %arg13[%c0_83, %c0_84, %c0_85] : memref<1x8x32xf32, #tpu.memory_space<vmem>>, vector<1x8x32xf32>
    %80 = vector.shape_cast %79 : vector<1x8x32xf32> to vector<8x32xf32>
    %c0_86 = arith.constant 0 : index
    %c0_87 = arith.constant 0 : index
    %81 = vector.load %arg7[%c0_86, %c0_87] : memref<32x32xf32, #tpu.memory_space<vmem>>, vector<32x32xf32>
    %cst_88 = arith.constant dense<0.000000e+00> : vector<8x32xf32>
    %82 = tpu.matmul %80, %81, %cst_88 {dimension_numbers = #tpu.dot_dimension_numbers<[1], [0], [0], [1], [0, 0, 1, 1], [], []>} : vector<8x32xf32>, vector<32x32xf32>, vector<8x32xf32> -> vector<8x32xf32>
    %c0_89 = arith.constant 0 : index
    %c0_90 = arith.constant 0 : index
    %83 = vector.load %arg8[%c0_89, %c0_90] : memref<1x32xf32, #tpu.memory_space<vmem>>, vector<1x32xf32>
    %84 = vector.broadcast %83 : vector<1x32xf32> to vector<8x32xf32>
    %85 = arith.addf %82, %84 : vector<8x32xf32>
    %c0_91 = arith.constant 0 : index
    %c0_92 = arith.constant 0 : index
    %86 = vector.load %arg9[%c0_91, %c0_92] : memref<8x32xf32, #tpu.memory_space<vmem>>, vector<8x32xf32>
    tpu.vector_store %arg9[%c0_91, %c0_92], %85 {strides = array<i32>} : memref<8x32xf32, #tpu.memory_space<vmem>>, vector<8x32xf32>,
    return
  }
  func.func @transform_0(%arg0: i32) -> (i32, i32) {
    %c0_i32 = arith.constant 0 : i32
    %c0_i32_0 = arith.constant 0 : i32
    return %arg0, %c0_i32 : i32, i32
  }
  func.func @transform_1(%arg0: i32) -> (i32, i32) {
    %c0_i32 = arith.constant 0 : i32
    %c0_i32_0 = arith.constant 0 : i32
    return %arg0, %c0_i32 : i32, i32
  }
  func.func @transform_2(%arg0: i32) -> (i32, i32) {
    %c0_i32 = arith.constant 0 : i32
    %c0_i32_0 = arith.constant 0 : i32
    return %arg0, %c0_i32 : i32, i32
  }
  func.func @transform_3(%arg0: i32) -> (i32, i32) {
    %c0_i32 = arith.constant 0 : i32
    %c0_i32_0 = arith.constant 0 : i32
    %c0_i32_1 = arith.constant 0 : i32
    return %c0_i32, %c0_i32_0 : i32, i32
  }
  func.func @transform_4(%arg0: i32) -> (i32, i32) {
    %c0_i32 = arith.constant 0 : i32
    %c0_i32_0 = arith.constant 0 : i32
    %c0_i32_1 = arith.constant 0 : i32
    return %c0_i32, %c0_i32_0 : i32, i32
  }
  func.func @transform_5(%arg0: i32) -> (i32, i32) {
    %c0_i32 = arith.constant 0 : i32
    %c0_i32_0 = arith.constant 0 : i32
    %c0_i32_1 = arith.constant 0 : i32
    return %c0_i32, %c0_i32_0 : i32, i32
  }
  func.func @transform_6(%arg0: i32) -> (i32, i32) {
    %c0_i32 = arith.constant 0 : i32
    %c0_i32_0 = arith.constant 0 : i32
    %c0_i32_1 = arith.constant 0 : i32
    return %c0_i32, %c0_i32_0 : i32, i32
  }
  func.func @transform_7(%arg0: i32) -> (i32, i32) {
    %c0_i32 = arith.constant 0 : i32
    %c0_i32_0 = arith.constant 0 : i32
    %c0_i32_1 = arith.constant 0 : i32
    return %c0_i32, %c0_i32_0 : i32, i32
  }
  func.func @transform_8(%arg0: i32) -> (i32, i32) {
    %c0_i32 = arith.constant 0 : i32
    %c0_i32_0 = arith.constant 0 : i32
    return %arg0, %c0_i32 : i32, i32
  }
}

</mosaic_0001>

<bundles_post_ra>
// kernel: tpu_custom_call.1
= control target key start
LH: loop header
LB: loop body
LE: loop exit
PB: predicated region body
PF: predicated region fallthrough
CT: control target
= control target key end

     0   :  { %s2734_s0 = inlined_call_operand.hbm [shape: f32[16,32], index: 0, kind: input, shape index: {}]   ;;  %s2735_s1 = inlined_call_operand.hbm [shape: f32[16,32], index: 1, kind: input, shape index: {}]   ;;  %s2736_s2 = inlined_call_operand.hbm [shape: f32[16,32], index: 2, kind: input, shape index: {}]   ;;  %s2737_s3 = inlined_call_operand.hbm [shape: f32[32,32], index: 3, kind: input, shape index: {}]   ;;  %s2738_s4 = inlined_call_operand.hbm [shape: f32[32,32], index: 4, kind: input, shape index: {}]   ;;  %s2739_s5 = inlined_call_operand.hbm [shape: f32[32,32], index: 5, kind: input, shape index: {}]   ;;  %s2740_s6 = inlined_call_operand.hbm [shape: f32[32,32], index: 6, kind: input, shape index: {}]   ;;  %s2741_s7 = inlined_call_operand.vmem [shape: f32[1,32], index: 7, kind: input, shape index: {}]   ;;  %s2742_s8 = inlined_call_operand.hbm [shape: f32[16,32], index: 8, kind: output, shape index: {}]  }
   0x1   :  { %2766 = sst [smem:[#allocation29_spill]] %s2735_s1 }
   0x2   :  { %2767 = sst [smem:[#allocation30_spill]] %s2737_s3 }
   0x3   :  { %2768 = sst [smem:[#allocation31_spill]] %s2739_s5 }
   0x4   :  { %2769 = sst [smem:[#allocation32_spill]] %s2741_s7 }
   0x5   :  { %2770 = sst [smem:[#allocation33_spill]] %s2742_s8 }
   0x6   :  { %13 = vsyncpa [#allocation7], 0 }
   0x7   :  { %15 = vsyncpa [#allocation7 + $0x1], 0 }
   0x8   :  { %16 = vsyncpa [#allocation10], 0 }
   0x9   :  { %18 = vsyncpa [#allocation10 + $0x1], 0 }
   0xa   :  { %19 = vsyncpa [#allocation13], 0 }
   0xb   :  { %20 = vsyncpa [#allocation16], 0 }
   0xc   :  { %21 = vsyncpa [#allocation8], 0 }
   0xd   :  { %23 = vsyncpa [#allocation8 + $0x1], 0  ;;  %s2292_s27 = smov 0   ;;  %s2294_s28 = smov 0  }
   0xe   :  { %s2296_s29 = smov 0   ;;  %s2298_s30 = smov 0  }
   0xf LB: > { %2771 = sst [smem:[#allocation24_spill]] %s2214_s27  ;;  %s2228_s9 = smov [#allocation12]   ;;  %s2226_s30 = sphi %s2298_s30, %s2809_s30   ;;  %s2222_s29 = sphi %s2296_s29, %s2813_s29   ;;  %s2218_s28 = sphi %s2294_s28, %s2812_s28   ;;  %s2214_s27 = sphi %s2292_s27, %s2811_s27  }
  0x10   : > { %2772 = sst [smem:[#allocation25_spill]] %s2226_s30  ;;  %s255_s10 = sshll.u32 %s2228_s9, 4  ;;  %s2318_s10 = int_to_ptr.vmem [resolvable:$true] %s255_s10 }
  0x11   : > { %s2313_s11 = sadd.s32 4294967295, %s2226_s30   ;;  %p1636_p0 = scmp.ge.s32.totalorder %s2226_s30, 1 }
  0x12   : > { %p2753_p1 = scmp.eq.s32.totalorder %s2313_s11, 0  ;;  %p243_p2 = scmp.lt.s32.totalorder %s2226_s30, 3 }
  0x13   : > { %s2229_s13 = smov [#allocation15]   ;;  %s2775_s3 = sld [smem:[#allocation30_spill]] }
  0x14   : > { %p2320_p3 = pnand %p1636_p0, %p243_p2  ;;  %s281_s14 = sshll.u32 %s2229_s13, 4  ;;  %s2333_s14 = int_to_ptr.vmem [resolvable:$true] %s281_s14 }
  0x16   : > { %s2773_s12 = scalar_select %p2320_p3, 1, 0 }
  0x17   : > { %p1846_p5 = pneg %p2320_p3 }
  0x19   : > { %p2329_p6 = pnand %p1846_p5, %p2753_p1  ;;  %s1946_s18 = scalar_lea.hbm %s2775_s3, 512 }
  0x1a   : > { %p1947_p7 = scmp.ne.s32.totalorder %s2775_s3, %s1946_s18  ;;  %p1953_p11 = scmp.lt.u32.totalorder %s1946_s18, %s2775_s3 }
  0x1b   : > { %s2774_s15 = scalar_select %p2329_p6, 1, 0 }
  0x1c   : > { %p2343_p8 = pneg %p2329_p6 }
  0x1e   : > { %s2776_s21 = scalar_select %p2343_p8, 1, 0 }
  0x1f   : > { %p1949_p9 = pnand %p2343_p8, %p1947_p7 }
  0x21   : > { %p1950_p10 = pneg %p1949_p9 }
  0x23   : > { %p1955_p12 = pnand %p1953_p11, %p1950_p10 }
  0x25   : > { %1958 = shalt.err (!%p1955_p12)
}
  0x26   : > { %s1959_s24 = scalar_lea.vmem %s2318_s10, 512  ;;  %p1967_p5 = scmp.lt.s32.totalorder %s2318_s10, %s2318_s10 }
  0x27   : > { %p1960_p13 = scmp.ne.s32.totalorder %s2318_s10, %s1959_s24  ;;  %p1968_p4 = scmp.lt.s32.totalorder %s1959_s24, %s1959_s24 }
  0x29   : > { %p1962_p0 = pnand %p1960_p13, %p2343_p8  ;;  %p1969_p7 = por %p1968_p4, %p1967_p5 }
  0x2b   : > { %p1963_p2 = pneg %p1962_p0 }
  0x2d   : > { %p1970_p9 = pnand %p1969_p7, %p1963_p2 }
  0x2f   : > { %1973 = shalt.err (!%p1970_p9)
}
  0x30   : > { %s2744_s25 = smov 128   ;;  %s2747_s26 = smov 8  }
  0x31   : > { %1849 = dma.hbm_to_vmem [thread:$0]  (!%p2329_p6), %s2775_s3, 512, %s2318_s10, [#allocation13], %s2744_s25, %s2744_s25, %s2747_s26  }
  0x32   : > { %s2777_s5 = sld [smem:[#allocation31_spill]] }
  0x38   : > { %s1974_s18 = scalar_lea.hbm %s2777_s5, 512 }
  0x39   : > { %p1975_p4 = scmp.ne.s32.totalorder %s2777_s5, %s1974_s18  ;;  %p1981_p12 = scmp.lt.u32.totalorder %s1974_s18, %s2777_s5 }
  0x3b   : > { %p1977_p10 = pnand %p1975_p4, %p2343_p8 }
  0x3d   : > { %p1978_p11 = pneg %p1977_p10 }
  0x3f   : > { %p1983_p13 = pnand %p1981_p12, %p1978_p11 }
  0x41   : > { %1986 = shalt.err (!%p1983_p13)
}
  0x42   : > { %s1987_s10 = scalar_lea.vmem %s2333_s14, 512  ;;  %p1995_p7 = scmp.lt.s32.totalorder %s2333_s14, %s2333_s14 }
  0x43   : > { %p1988_p0 = scmp.ne.s32.totalorder %s2333_s14, %s1987_s10  ;;  %p1996_p9 = scmp.lt.s32.totalorder %s1987_s10, %s1987_s10 }
  0x45   : > { %p1990_p2 = pnand %p1988_p0, %p2343_p8  ;;  %p1997_p4 = por %p1996_p9, %p1995_p7 }
  0x47   : > { %p1991_p5 = pneg %p1990_p2 }
  0x49   : > { %p1998_p10 = pnand %p1997_p4, %p1991_p5 }
  0x4b   : > { %2001 = shalt.err (!%p1998_p10)
}
  0x4c   : > { %1855 = dma.hbm_to_vmem [thread:$0]  (!%p2329_p6), %s2777_s5, 512, %s2333_s14, [#allocation16], %s2744_s25, %s2744_s25, %s2747_s26  }
  0x4d   : > { %s1635_s13 = sadd.s32 4294967294, %s2226_s30   ;;  %s2395_s16 = sadd.s32 1, %s2226_s30  }
  0x4e   : > { %2778 = sst [smem:[#allocation26_spill]] %s2395_s16  ;;  %s33_s17 = ssub.s32 %s2226_s30, %s2395_s16 }
  0x4f   : > { %s36_s18 = sadd.s32 1, %s2222_s29  ;;  %p34_p11 = scmp.eq.s32.totalorder %s33_s17, 0 }
  0x50   : > { %p43_p12 = scmp.ne.s32.totalorder %s2222_s29, %s2218_s28  ;;  %p44_p13 = scmp.eq.s32.totalorder %s2226_s30, 0 }
  0x51   : > { %p49_p0 = scmp.ne.s32.totalorder %s2218_s28, %s2214_s27  ;;  %p230_p7 = scmp.eq.s32.totalorder %s2313_s11, 1 }
  0x52   : > { %s2406_s19 = scalar_select %p34_p11, %s2222_s29, %s36_s18  }
  0x53   : > { %p45_p2 = por %p44_p13, %p43_p12  ;;  %p2410_p5 = por %p2753_p1, %p49_p0 }
  0x54   : > { %2779 = sst [smem:[#allocation27_spill]] %s2406_s19  ;;  %p236_p9 = scmp.eq.s32.totalorder %s1635_s13, 1 }
  0x55   : > { %s2780_s20 = scalar_select %p2410_p5, 1, 0 }
  0x56   : > { %p1877_p4 = scmp.lt.s32.totalorder %s2226_s30, 2  ;;  %s2746_s14 = sand.u32 1, %s2222_s29  }
  0x57   : > { %p2417_p10 = por %p230_p7, %p43_p12  ;;  %p2421_p3 = por %p236_p9, %p49_p0 }
  0x58   : > { %s2427_s10 = sshll.u32 %s2746_s14, 3  ;;  %s2430_s24 = sshll.u32 %s2226_s30, 7 }
  0x59   : > { %s2781_s22 = scalar_select %p2417_p10, 1, 0 }
  0x5a   : > { %s2782_s23 = scalar_select %p2421_p3, 1, 0 }
  0x5b   : > { %p2432_p11 = pnand %p1877_p4, %p45_p2  ;;  %s329_s13 = sand.u32 1, %s2226_s30  }
  0x5c   : > { %2783 = sst [smem:[#allocation28_spill]] %s2782_s23  ;;  %s2785_s1 = sld [smem:[#allocation29_spill]] }
  0x5d   : > { %s2784_s9 = scalar_select %p2432_p11, 1, 0 }
  0x5e   : > { %s333_s14 = scalar_lea.vmem [#allocation9], %s2427_s10  ;;  %s2232_s3 = smov [#allocation14]  }
  0x5f   : > { %s340_s26 = sshll.u32 %s333_s14, 4  ;;  %s2446_s5 = sshll.u32 %s2232_s3, 4  ;;  %s2444_s26 = int_to_ptr.vmem [resolvable:$true] %s340_s26  ;;  %s269_s5 = int_to_ptr.vmem [resolvable:$true] %s2446_s5 }
  0x60   : > { %s2448_s19 = scalar_lea.sflag [#allocation10], %s329_s13  ;;  %p2454_p13 = pneg %p2432_p11 }
  0x62   : > { %s2441_s25 = scalar_lea.hbm %s2785_s1, %s2430_s24  ;;  %s2007_s30 = scalar_lea.hbm %s2785_s1, 256 }
  0x63   : > { %s2002_s16 = scalar_lea.hbm %s2441_s25, 128  ;;  %p2008_p7 = scmp.lt.u32.totalorder %s2441_s25, %s2785_s1 }
  0x64   : > { %p2003_p12 = scmp.ne.s32.totalorder %s2441_s25, %s2002_s16  ;;  %p2009_p9 = scmp.lt.u32.totalorder %s2007_s30, %s2002_s16 }
  0x65   : > { %s2786_s17 = scalar_select %p2454_p13, 1, 0 }
  0x66   : > { %p2005_p0 = pnand %p2454_p13, %p2003_p12  ;;  %p2010_p4 = por %p2009_p9, %p2008_p7 }
  0x67   : > { %p2011_p1 = scmp.lt.u32.totalorder %s2002_s16, %s2441_s25 }
  0x68   : > { %p2006_p2 = pneg %p2005_p0 }
  0x69   : > { %p2012_p3 = por %p2011_p1, %p2010_p4 }
  0x6b   : > { %p2013_p10 = pnand %p2012_p3, %p2006_p2 }
  0x6d   : > { %2016 = shalt.err (!%p2013_p10)
}
  0x6e   : > { %s2017_s13 = scalar_lea.vmem %s2444_s26, 128  ;;  %s2233_s18 = smov [#allocation9]  }
  0x6f   : > { %p2018_p12 = scmp.ne.s32.totalorder %s2444_s26, %s2017_s13  ;;  %s2022_s14 = sshll.u32 %s2233_s18, 4  ;;  %s2023_s14 = int_to_ptr.vmem [resolvable:$false] %s2022_s14 }
  0x70   : > { %s2024_s23 = scalar_lea.vmem %s2023_s14, 256  ;;  %p2025_p6 = scmp.lt.s32.totalorder %s2444_s26, %s2023_s14 }
  0x71   : > { %p2020_p0 = pnand %p2018_p12, %p2454_p13  ;;  %p2026_p8 = scmp.lt.s32.totalorder %s2024_s23, %s2017_s13 }
  0x73   : > { %p2021_p5 = pneg %p2020_p0  ;;  %p2027_p7 = por %p2026_p8, %p2025_p6 }
  0x75   : > { %p2028_p9 = pnand %p2027_p7, %p2021_p5 }
  0x77   : > { %2031 = shalt.err (!%p2028_p9)
}
  0x78   : > { %1865 = dma.hbm_to_vmem [thread:$0]  (!%p2432_p11), %s2441_s25, 128, %s2444_s26, %s2448_s19  }
  0x79   : > { %s2032_s3 = scalar_lea.hbm %s2738_s4, 512  ;;  %p2787_p3 = scmp.ne.s32.totalorder %s2776_s21, 0 }
  0x7a   : > { %p2033_p1 = scmp.ne.s32.totalorder %s2738_s4, %s2032_s3  ;;  %p2039_p5 = scmp.lt.u32.totalorder %s2032_s3, %s2738_s4 }
  0x7c   : > { %p2035_p6 = pnand %p2033_p1, %p2787_p3 }
  0x7e   : > { %p2036_p8 = pneg %p2035_p6 }
  0x80   : > { %p2041_p10 = pnand %p2039_p5, %p2036_p8 }
  0x82   : > { %2044 = shalt.err (!%p2041_p10)
}
  0x83   : > { %s2045_s23 = scalar_lea.vmem %s269_s5, 512  ;;  %p2053_p0 = scmp.lt.s32.totalorder %s269_s5, %s269_s5 }
  0x84   : > { %p2046_p2 = scmp.ne.s32.totalorder %s269_s5, %s2045_s23  ;;  %p2054_p7 = scmp.lt.s32.totalorder %s2045_s23, %s2045_s23 }
  0x86   : > { %p2048_p4 = pnand %p2046_p2, %p2787_p3  ;;  %p2055_p9 = por %p2054_p7, %p2053_p0 }
  0x88   : > { %p2049_p12 = pneg %p2048_p4 }
  0x8a   : > { %p2056_p11 = pnand %p2055_p9, %p2049_p12 }
  0x8c   : > { %2059 = shalt.err (!%p2056_p11)
}
  0x8d   : > { %p2788_p1 = scmp.ne.s32.totalorder %s2774_s15, 0  ;;  %s2789_s1 = smov 8  }
  0x8e   : > { %s2790_s25 = smov 128   ;;  %s2234_s16 = smov [#allocation17]  }
  0x8f   : > { %1852 = dma.hbm_to_vmem [thread:$0]  (!%p2788_p1), %s2738_s4, 512, %s269_s5, [#allocation13], %s2790_s25, %s2790_s25, %s2789_s1  }
  0x90   : > { %s294_s3 = sshll.u32 %s2234_s16, 4  ;;  %s2060_s14 = scalar_lea.hbm %s2740_s6, 512  ;;  %s295_s3 = int_to_ptr.vmem [resolvable:$true] %s294_s3 }
  0x91   : > { %p2061_p11 = scmp.ne.s32.totalorder %s2740_s6, %s2060_s14  ;;  %p2067_p5 = scmp.lt.u32.totalorder %s2060_s14, %s2740_s6 }
  0x93   : > { %p2063_p6 = pnand %p2061_p11, %p2787_p3 }
  0x95   : > { %p2064_p8 = pneg %p2063_p6 }
  0x97   : > { %p2069_p10 = pnand %p2067_p5, %p2064_p8 }
  0x99   : > { %2072 = shalt.err (!%p2069_p10)
}
  0x9a   : > { %s2073_s5 = scalar_lea.vmem %s295_s3, 512  ;;  %p2081_p0 = scmp.lt.s32.totalorder %s295_s3, %s295_s3 }
  0x9b   : > { %p2074_p2 = scmp.ne.s32.totalorder %s295_s3, %s2073_s5  ;;  %p2082_p7 = scmp.lt.s32.totalorder %s2073_s5, %s2073_s5 }
  0x9d   : > { %p2076_p4 = pnand %p2074_p2, %p2787_p3  ;;  %p2083_p9 = por %p2082_p7, %p2081_p0 }
  0x9f   : > { %p2077_p12 = pneg %p2076_p4 }
  0xa1   : > { %p2084_p13 = pnand %p2083_p9, %p2077_p12 }
  0xa3   : > { %2087 = shalt.err (!%p2084_p13)
}
  0xa4   : > { %1858 = dma.hbm_to_vmem [thread:$0]  (!%p2788_p1), %s2740_s6, 512, %s295_s3, [#allocation16], %s2790_s25, %s2790_s25, %s2789_s1  }
  0xa5   : > { %s2525_s26 = scalar_lea.hbm %s2734_s0, %s2430_s24  ;;  %s315_s15 = scalar_lea.vmem [#allocation6], %s2427_s10 }
  0xa6   : > { %s322_s30 = sshll.u32 %s315_s15, 4  ;;  %s2791_s16 = sand.u32 1, %s2222_s29   ;;  %s323_s30 = int_to_ptr.vmem [resolvable:$true] %s322_s30 }
  0xa7   : > { %s312_s18 = scalar_lea.sflag [#allocation7], %s2791_s16  ;;  %s2088_s13 = scalar_lea.hbm %s2525_s26, 128 }
  0xa8   : > { %p2089_p13 = scmp.ne.s32.totalorder %s2525_s26, %s2088_s13  ;;  %p2792_p3 = scmp.ne.s32.totalorder %s2786_s17, 0 }
  0xa9   : > { %s2093_s3 = scalar_lea.hbm %s2734_s0, 256  ;;  %p2094_p1 = scmp.lt.u32.totalorder %s2525_s26, %s2734_s0 }
  0xaa   : > { %p2091_p11 = pnand %p2089_p13, %p2792_p3  ;;  %p2095_p8 = scmp.lt.u32.totalorder %s2093_s3, %s2088_s13 }
  0xab   : > { %p2097_p10 = scmp.lt.u32.totalorder %s2088_s13, %s2525_s26 }
  0xac   : > { %p2092_p6 = pneg %p2091_p11  ;;  %p2096_p5 = por %p2095_p8, %p2094_p1 }
  0xae   : > { %p2098_p2 = por %p2097_p10, %p2096_p5 }
  0xb0   : > { %p2099_p4 = pnand %p2098_p2, %p2092_p6 }
  0xb2   : > { %2102 = shalt.err (!%p2099_p4)
}
  0xb3   : > { %s2103_s5 = scalar_lea.vmem %s323_s30, 128  ;;  %s2235_s7 = smov [#allocation6]  }
  0xb4   : > { %p2104_p12 = scmp.ne.s32.totalorder %s323_s30, %s2103_s5  ;;  %s2108_s8 = sshll.u32 %s2235_s7, 4  ;;  %s2109_s8 = int_to_ptr.vmem [resolvable:$false] %s2108_s8 }
  0xb5   : > { %s2110_s27 = scalar_lea.vmem %s2109_s8, 256  ;;  %p2111_p9 = scmp.lt.s32.totalorder %s323_s30, %s2109_s8 }
  0xb6   : > { %p2106_p0 = pnand %p2104_p12, %p2792_p3  ;;  %p2112_p13 = scmp.lt.s32.totalorder %s2110_s27, %s2103_s5 }
  0xb8   : > { %p2107_p7 = pneg %p2106_p0  ;;  %p2113_p11 = por %p2112_p13, %p2111_p9 }
  0xba   : > { %p2114_p1 = pnand %p2113_p11, %p2107_p7 }
  0xbc   : > { %2117 = shalt.err (!%p2114_p1)
}
  0xbd   : > { %p2793_p8 = scmp.ne.s32.totalorder %s2784_s9, 0  ;;  %s2551_s16 = scalar_lea.hbm %s2736_s2, %s2430_s24 }
  0xbe   : > { %s351_s13 = scalar_lea.vmem [#allocation11], %s2427_s10  ;;  %s2118_s25 = scalar_lea.hbm %s2551_s16, 128 }
  0xbf   : > { %1862 = dma.hbm_to_vmem [thread:$0]  (!%p2793_p8), %s2525_s26, 128, %s323_s30, %s312_s18  }
  0xc0   : > { %s358_s1 = sshll.u32 %s351_s13, 4  ;;  %p2119_p6 = scmp.ne.s32.totalorder %s2551_s16, %s2118_s25  ;;  %s359_s1 = int_to_ptr.vmem [resolvable:$true] %s358_s1 }
  0xc1   : > { %s2123_s26 = scalar_lea.hbm %s2736_s2, 256  ;;  %p2124_p2 = scmp.lt.u32.totalorder %s2551_s16, %s2736_s2 }
  0xc2   : > { %p2121_p5 = pnand %p2119_p6, %p2792_p3  ;;  %p2125_p4 = scmp.lt.u32.totalorder %s2123_s26, %s2118_s25 }
  0xc3   : > { %p2127_p0 = scmp.lt.u32.totalorder %s2118_s25, %s2551_s16 }
  0xc4   : > { %p2122_p10 = pneg %p2121_p5  ;;  %p2126_p12 = por %p2125_p4, %p2124_p2 }
  0xc6   : > { %p2128_p7 = por %p2127_p0, %p2126_p12 }
  0xc8   : > { %p2129_p9 = pnand %p2128_p7, %p2122_p10 }
  0xca   : > { %2132 = shalt.err (!%p2129_p9)
}
  0xcb   : > { %s2133_s10 = scalar_lea.vmem %s359_s1, 128  ;;  %s2236_s24 = smov [#allocation11]  }
  0xcc   : > { %p2134_p13 = scmp.ne.s32.totalorder %s359_s1, %s2133_s10  ;;  %s2138_s23 = sshll.u32 %s2236_s24, 4  ;;  %s2139_s23 = int_to_ptr.vmem [resolvable:$false] %s2138_s23 }
  0xcd   : > { %s2140_s5 = scalar_lea.vmem %s2139_s23, 256  ;;  %p2141_p6 = scmp.lt.s32.totalorder %s359_s1, %s2139_s23 }
  0xce   : > { %p2136_p11 = pnand %p2134_p13, %p2792_p3  ;;  %p2142_p5 = scmp.lt.s32.totalorder %s2140_s5, %s2133_s10 }
  0xd0   : > { %p2137_p1 = pneg %p2136_p11  ;;  %p2143_p8 = por %p2142_p5, %p2141_p6 }
  0xd2   : > { %p2144_p2 = pnand %p2143_p8, %p2137_p1 }
  0xd4   : > { %2147 = shalt.err (!%p2144_p2)
}
  0xd5   : > { %p2794_p4 = scmp.ne.s32.totalorder %s2784_s9, 0  ;;  %p2795_p10 = scmp.ne.s32.totalorder %s2773_s12, 0 }
  0xd6   : > { %s2575_s17 = sand.u32 (!%p2795_p10), 1, %s2218_s28   ;;  %p2796_p3 = scmp.ne.s32.totalorder (!%p2795_p10), %s2780_s20, 0 }
  0xd7   : > { %1868 = dma.hbm_to_vmem [thread:$0]  (!%p2794_p4), %s2551_s16, 128, %s359_s1, %s2448_s19  }
  0xd8   : > { %367 = sbr.rel (%p2795_p10) target bundleno = 1784 (0x6f8), region = 52  ;;  %s2578_s7 = sshll.u32 (!%p2795_p10), %s2575_s17, 3 }
  0xd9   : > { %s370_s8 = scalar_lea.sflag (!%p2795_p10), [#allocation7], %s2575_s17  ;;  %s373_s27 = scalar_lea.vmem (!%p2795_p10), [#allocation6], %s2578_s7 }
  0xdf   : > { %2193 = dma.done.wait (%p2796_p3), %s370_s8, 128  }
  0xe0   : > { %2195 = vsyncadd (%p2796_p3), %s370_s8, 4294967168  ;;  %s378_s12 = sand.u32 1, %s2313_s11   ;;  %s382_s9 = scalar_lea.vmem [#allocation9], %s2578_s7 }
  0xe1   : > { %s379_s19 = scalar_lea.sflag [#allocation10], %s378_s12 }
  0xe2   : > { %2197 = dma.done.wait (%p2796_p3), %s379_s19, 256  }
  0xe3   : > { %2199 = vsyncadd (%p2796_p3), %s379_s19, 4294967040  ;;  %s391_s21 = scalar_lea.vmem [#allocation11], %s2578_s7  ;;  %p2797_p8 = scmp.eq.s32.totalorder %s2313_s11, 0 }
  0xe5   : > { %2201 = dma.done.wait (%p2797_p8), [#allocation13], 1024   ;;  %p2798_p12 = pmov %p2797_p8 }
  0xe6   : > { %p2799_p0 = pmov %p2797_p8 }
  0xe7   : > { %2203 = vsyncadd (%p2798_p12), [#allocation13], 4294966272 }
  0xe8   : > { %2205 = dma.done.wait (%p2799_p0), [#allocation16], 1024   ;;  %p2800_p7 = pmov %p2799_p0 }
  0xe9   : > { %v2237_v0 = vmov 0.0|0.0   ;;  %vm2238_vm0 = vmmov 0   ;;  %v2239_v1 = vmov 0.0   ;;  %v451_v2 = vld [vmem:[#allocation12] sm:$0xff]  ;;  %v452_v3 = vld [vmem:[#allocation12 + $0x8] sm:$0xff]  ;;  %v453_v7 = vld [vmem:[#allocation12 + $0x10] sm:$0xff] }
  0xea   : > { %2207 = vsyncadd (%p2800_p7), [#allocation16], 4294966272  ;;  %1798 = vmatprep.subr.bf16.mxu0 %v2237_v0  ;;  %1804 = vmatprep.subr.bf16.mxu1 %v2237_v0  ;;  %v531_v4 = vld [vmem:[#allocation14] sm:$0xff]  ;;  %v1799_v5 = vpack.c.bf16 %v452_v3, %v451_v2  ;;  %v532_v6 = vld [vmem:[#allocation14 + $0x8] sm:$0xff]  ;;  %vm455_vm1 = vcmask 261120   ;;  %vm691_vm2 = vcmask 64512  }
  0xeb   : > { %1722 = vmatprep.mubr.msk.f32.mxu0 %vm2238_vm0, %v2239_v1  ;;  %1733 = vmatprep.mubr.msk.f32.mxu1 %vm2238_vm0, %v2239_v1  ;;  %v454_v8 = vld [vmem:[#allocation12 + $0x18] sm:$0xff]  ;;  %v1805_v9 = vpack.c.bf16 %v532_v6, %v531_v4  ;;  %v533_v10 = vld [vmem:[#allocation14 + $0x10] sm:$0xff]  ;;  %v530_v15 = vld [vmem:[%s382_s9] sm:$0xff]  ;;  %s2240_s20 = smov 120   ;;  %s2241_s15 = smov 112   ;;  %vm1028_vm3 = vcmask 130112  }
  0xec   : > { %v534_v11 = vld [vmem:[#allocation14 + $0x18] sm:$0xff]  ;;  %1800 = vmatpush3.bf16.msra.mxu0 %v1799_v5  ;;  %v1802_v12 = vpack.c.bf16 %v454_v8, %v453_v7  ;;  %v610_v16 = vld [vmem:[#allocation15] sm:$0xff]  ;;  %v611_v17 = vld [vmem:[#allocation15 + $0x8] sm:$0xff]  ;;  %s2242_s16 = smov 104   ;;  %s2243_s13 = smov 8   ;;  %vm1205_vm4 = vcmask 195712  }
  0xed   : > { %1806 = vmatpush3.bf16.msra.mxu1 %v1805_v9  ;;  %1801 = vmatprep.subr.bf16.mxu0 %v2237_v0  ;;  %v1808_v13 = vpack.c.bf16 %v534_v11, %v533_v10  ;;  %v450_v14 = vld [vmem:[%s373_s27] sm:$0xff]  ;;  %v1811_v19 = vpack.c.bf16 %v611_v17, %v610_v16  ;;  %s2244_s1 = smov 16   ;;  %s2245_s25 = smov 24   ;;  %vm1382_vm5 = vcmask 261312  }
  0xee   : > { %1807 = vmatprep.subr.bf16.mxu1 %v2237_v0  ;;  %v612_v18 = vld [vmem:[#allocation15 + $0x10] sm:$0xff]  ;;  %v613_v20 = vld [vmem:[#allocation15 + $0x18] sm:$0xff]  ;;  %s2801_s26 = sld [smem:[#allocation32_spill]]  ;;  %s1675_s30 = sshll.u32 %s2313_s11, 7 }
  0xef   : > { %v1814_v21 = vpack.c.bf16 %v613_v20, %v612_v18  ;;  %v609_v22 = vld [vmem:[%s391_s21] sm:$0xff]  ;;  %v1386_v20 = vld [vmem:[#allocation17 + $0x8] sm:$0xff]  ;;  %s449_s18 = scalar_lea.vmem [#allocation18], %s2578_s7  ;;  %s2802_s5 = sld [smem:[#allocation33_spill]] }
  0xf0   : > { %1803 = vmatpush3.bf16.msra.mxu0 %v1802_v12  ;;  %s1484_s10 = sshll.u32 %s449_s18, 4  ;;  %s1471_s27 = scalar_lea.sflag [#allocation8], %s2575_s17  ;;  %s2691_s10 = int_to_ptr.vmem [resolvable:$true] %s1484_s10 }
  0xf1   : > { %1809 = vmatpush3.bf16.msra.mxu1 %v1808_v13  ;;  %1810 = vmatprep.subr.bf16.mxu0 %v2237_v0  ;;  %s2148_s12 = scalar_lea.vmem %s2691_s10, 128  ;;  %p2803_p13 = scmp.ne.s32.totalorder %s2781_s22, 0 }
  0xf2   : > { %1747 = vmatprep.subr.mxu1 %v2239_v1  ;;  %p2149_p9 = scmp.ne.s32.totalorder %s2691_s10, %s2148_s12  ;;  %s2246_s11 = smov [#allocation18]  }
  0xf3   : > { %1723 = vmatmul.mubr.msk.f32.vlgmr.msra.gmra.mrb[0].mxu0 %vm455_vm1, %v450_v14  ;;  %s2152_s7 = sshll.u32 %s2246_s11, 4  ;;  %s2153_s7 = int_to_ptr.vmem [resolvable:$false] %s2152_s7 }
  0xf4   : > { %1734 = vmatmul.mubr.msk.f32.vlgmr.msra.gmra.mrb[0].mxu1 %vm455_vm1, %v530_v15  ;;  %1744 = vmatprep.mubr.msk.f32.mxu0 %vm2238_vm0, %v2239_v1  ;;  %p2150_p11 = pnand %p2149_p9, %p2803_p13  ;;  %s2154_s19 = scalar_lea.vmem %s2153_s7, 256 }
  0xf5   : > { %1749 = vmatprep.mubr.msk.f32.mxu1 %vm2238_vm0, %v2239_v1  ;;  %1812 = vmatpush3.bf16.msra.mxu0 %v1811_v19  ;;  %v1385_v19 = vld [vmem:[#allocation17] sm:$0xff]  ;;  %s2689_s8 = scalar_lea.hbm %s2802_s5, %s1675_s30  ;;  %p2155_p6 = scmp.lt.s32.totalorder %s2691_s10, %s2153_s7 }
  0xf6   : > { %1813 = vmatprep.subr.bf16.mxu0 %v2237_v0  ;;  %p2151_p1 = pneg %p2150_p11  ;;  %p2156_p5 = scmp.lt.s32.totalorder %s2154_s19, %s2148_s12 }
  0xf8   : > { %p2157_p2 = por %p2156_p5, %p2155_p6 }
  0xf9   : > { %1815 = vmatpush3.bf16.msra.mxu0 %v1814_v21  ;;  %v1387_v21 = vld [vmem:[#allocation17 + $0x10] sm:$0xff] }
  0xfa   : > { %1767 = vmatprep.subr.mxu0 %v2239_v1  ;;  %p2158_p4 = pnand %p2157_p2, %p2151_p1 }
  0xfc   : > { %1745 = vmatmul.mubr.msk.f32.vlgmr.msra.gmra.mrb[2].mxu0 %vm455_vm1, %v609_v22  ;;  %v1388_v22 = vld [vmem:[#allocation17 + $0x18] sm:$0xff] }
  0xfd   : > { %1769 = vmatprep.mubr.msk.f32.mxu0 %vm2238_vm0, %v2239_v1 }
 0x1c6   : > { %v525_v23 = vpop.f32.mrb[0].mxu0 }
 0x1c7   : > { %529 = vst.msk [vmem:[#allocation2] sm:$0xff] %vm455_vm1, %v525_v23  ;;  %v604_v24 = vpop.f32.mrb[0].mxu1  ;;  %v1724_v25 = vpop.f32.mrb[1].mxu0 }
 0x1c8   : > { %608 = vst.msk [vmem:[#allocation3] sm:$0xff] %vm455_vm1, %v604_v24  ;;  %v1735_v26 = vpop.f32.mrb[1].mxu1  ;;  %v1820_v25 = vpack.c.bf16 %v1388_v22, %v1387_v21 }
 0x1ce   : > { %v853_v27 = vld [vmem:[#allocation2] sm:$0xff] }
 0x1cf   : > { %v689_v28 = vld [vmem:[#allocation3] sm:$0xff]  ;;  %857 = vrot.lane.b32.xlu1 %v853_v27, %s2240_s20  ;;  %v683_v29 = vpop.f32.mrb[2].mxu0 }
 0x1d0   : > { %1748 = vmatpush3.xpose.msk.msra.mxu1 %vm691_vm2, %v689_v28  ;;  %687 = vst.msk [vmem:[#allocation4] sm:$0xff] %vm455_vm1, %v683_v29  ;;  %v1746_v30 = vpop.f32.mrb[3].mxu0 }
 0x1d1   : > { %1752 = vmatprep.subr.mxu1 %v2239_v1 }
 0x1d3   : > { %1750 = vmatmul.mubr.msk.f32.vlgmr.msra.gmra.mrb[2].mxu1 %vm691_vm2, %v853_v27  ;;  %1037 = vrot.lane.b32.xlu1 %v689_v28, %s2241_s15 }
 0x1d4   : > { %1754 = vmatprep.mubr.msk.f32.mxu1 %vm2238_vm0, %v2239_v1 }
 0x1d7   : > { %1034 = vrot.lane.b32.xlu1 %v853_v27, %s2241_s15  ;;  %v1032_v33 = vld [vmem:[#allocation4] sm:$0xff] }
 0x1d8   : > { %1753 = vmatpush3.msra.mxu1 %v1032_v33 }
 0x1d9   : > { %1757 = vmatprep.subr.mxu1 %v2239_v1 }
 0x1db   : > { %1214 = vrot.lane.b32.xlu1 %v689_v28, %s2242_s16 }
 0x1df   : > { %1211 = vrot.lane.b32.xlu1 %v853_v27, %s2242_s16 }
 0x1e3   : > { %1123 = vrot.lane.b32.xlu1 %v1032_v33, %s2241_s15 }
 0x241   : > { %v858_v31 = vpop.permute.xlu1 %857 }
 0x245   : > { %v1038_v32 = vpop.permute.xlu1 %1037 }
 0x246   : > { %1768 = vmatpush3.xpose.msk.msra.mxu0 %vm691_vm2, %v1038_v32 }
 0x247   : > { %1777 = vmatprep.subr.mxu0 %v2239_v1 }
 0x249   : > { %v1035_v34 = vpop.permute.xlu1 %1034 }
 0x24a   : > { %1770 = vmatmul.mubr.msk.f32.vlgmr.msra.gmra.mrb[4].mxu0 %vm691_vm2, %v1035_v34 }
 0x24b   : > { %1779 = vmatprep.mubr.msk.f32.mxu0 %vm2238_vm0, %v2239_v1 }
 0x24d   : > { %v1215_v35 = vpop.permute.xlu1 %1214 }
 0x24e   : > { %1778 = vmatpush3.xpose.msk.msra.mxu0 %vm691_vm2, %v1215_v35 }
 0x24f   : > { %1816 = vmatprep.subr.bf16.mxu0 %v2237_v0 }
 0x251   : > { %v1212_v36 = vpop.permute.xlu1 %1211 }
 0x252   : > { %1780 = vmatmul.mubr.msk.f32.vlgmr.msra.gmra.mrb[6].mxu0 %vm691_vm2, %v1212_v36 }
 0x253   : > { %1795 = vmatprep.mubr.msk.f32.mxu0 %vm2238_vm0, %v2239_v1 }
 0x255   : > { %v1124_v62 = vpop.permute.xlu1 %1123 }
 0x2a6   : > { %v764_v37 = vpop.f32.mrb[2].mxu1 }
 0x2a7   : > { %v1751_v38 = vpop.f32.mrb[3].mxu1  ;;  %v768_v39 = vsel %vm691_vm2, %v764_v37, -inf }
 0x2a8   : > { %769 = vmax.xlane.f32.xlu0 %v768_v39  ;;  %v1672_v39 = vld [vmem:[%s2801_s26] ss:$0 sm:$0xff] }
 0x2be   : > { %860 = vrot.lane.b32.xlu0 %v689_v28, %s2240_s20 }
 0x31d   : > { %v1109_v40 = vpop.f32.mrb[4].mxu0 }
 0x31e   : > { %v1771_v41 = vpop.f32.mrb[5].mxu0  ;;  %v1113_v42 = vsel %vm691_vm2, %v1109_v40, -inf }
 0x31f   : > { %1114 = vmax.xlane.f32.xlu0 %v1113_v42 }
 0x325   : > { %v1286_v43 = vpop.f32.mrb[6].mxu0 }
 0x326   : > { %v1781_v44 = vpop.f32.mrb[7].mxu0  ;;  %v1290_v45 = vsel %vm691_vm2, %v1286_v43, -inf }
 0x327   : > { %1291 = vmax.xlane.f32.xlu1 %v1290_v45 }
 0x335   : > { %v770_v46 = vpop.xlane.xlu0 %769  ;;  %946 = vrot.lane.b32.xlu0 %v1032_v33, %s2240_s20 }
 0x336   : > { %v771_v47 = vsub.f32 %v764_v37, %v770_v46 }
 0x338   : > { %v772_v48 = vmul.f32 1.442695, %v771_v47 }
 0x339   : > { %v861_v50 = vpop.permute.xlu0 %860 }
 0x33a   : > { %1930 = vpow2.f32 %v772_v48 }
 0x344   : > { %v1931_v49 = vpop.eup %1930 }
 0x345   : > { %1755 = vmatmul.mubr.msk.f32.vlgmr.msra.gmra.mrb[4].mxu1 %vm691_vm2, %v1931_v49  ;;  %v774_v12 = vsel %vm691_vm2, %v1931_v49, 0.0 }
 0x346   : > { %1758 = vmatpush3.xpose.msk.msra.mxu1 %vm691_vm2, %v861_v50  ;;  %1759 = vmatprep.mubr.msk.f32.mxu1 %vm2238_vm0, %v2239_v1 }
 0x347   : > { %1762 = vmatprep.subr.mxu1 %v2239_v1 }
 0x349   : > { %1760 = vmatmul.mubr.msk.f32.vlgmr.msra.gmra.mrb[6].mxu1 %vm691_vm2, %v858_v31 }
 0x34a   : > { %1764 = vmatprep.mubr.msk.f32.mxu1 %vm2238_vm0, %v2239_v1 }
 0x3ac   : > { %v1115_v51 = vpop.xlane.xlu0 %1114 }
 0x3ad   : > { %v1116_v52 = vsub.f32 %v1109_v40, %v1115_v51 }
 0x3af   : > { %v1117_v59 = vmul.f32 1.442695, %v1116_v52 }
 0x3b0   : > { %v947_v53 = vpop.permute.xlu0 %946 }
 0x3b1   : > { %1763 = vmatpush3.msra.mxu1 %v947_v53  ;;  %1932 = vpow2.f32 %v1117_v59 }
 0x3b2   : > { %1772 = vmatprep.subr.mxu1 %v2239_v1 }
 0x3b4   : > { %v1292_v63 = vpop.xlane.xlu1 %1291 }
 0x3b5   : > { %v1293_v2 = vsub.f32 %v1286_v43, %v1292_v63 }
 0x3b7   : > { %v1294_v5 = vmul.f32 1.442695, %v1293_v2 }
 0x3bb   : > { %v1933_v60 = vpop.eup %1932 }
 0x3bc   : > { %v1119_v61 = vsel %vm691_vm2, %v1933_v60, 0.0 }
 0x418   : > { %v846_v54 = vpop.f32.mrb[4].mxu1 }
 0x419   : > { %v1756_v55 = vpop.f32.mrb[5].mxu1 }
 0x41c   : > { %v932_v56 = vpop.f32.mrb[6].mxu1 }
 0x41d   : > { %v1761_v57 = vpop.f32.mrb[7].mxu1  ;;  %v936_v58 = vsel %vm691_vm2, %v932_v56, -inf }
 0x41e   : > { %937 = vmax.xlane.f32.xlu1 %v936_v58 }
 0x42f   : > { %1300 = vrot.lane.b32.xlu1 %v1032_v33, %s2242_s16 }
 0x453   : > { %1120 = vadd.xlane.f32.xlu1 %v1119_v61 }
 0x4ab   : > { %v938_v3 = vpop.xlane.xlu1 %937 }
 0x4ac   : > { %v939_v4 = vsub.f32 %v932_v56, %v938_v3 }
 0x4ae   : > { %v940_v6 = vmul.f32 1.442695, %v939_v4 }
 0x4af   : > { %v1301_v10 = vpop.permute.xlu1 %1300 }
 0x4b0   : > { %1934 = vpow2.f32 %v940_v6 }
 0x4b1   : > { %1936 = vpow2.f32 %v1294_v5 }
 0x4ba   : > { %v1935_v7 = vpop.eup %1934 }
 0x4bb   : > { %1765 = vmatmul.mubr.msk.f32.vlgmr.msra.gmra.mrb[8].mxu1 %vm691_vm2, %v1935_v7  ;;  %v942_v8 = vsel %vm691_vm2, %v1935_v7, 0.0  ;;  %v1937_v9 = vpop.eup %1936 }
 0x4bc   : > { %1773 = vmatpush3.msra.mxu1 %v1124_v62  ;;  %943 = vadd.xlane.f32.xlu0 %v942_v8  ;;  %v1296_v11 = vsel %vm691_vm2, %v1937_v9, 0.0 }
 0x4bd   : > { %1774 = vmatprep.mubr.msk.f32.mxu1 %vm2238_vm0, %v2239_v1  ;;  %1782 = vmatprep.subr.mxu1 %v2239_v1 }
 0x4bf   : > { %1775 = vmatmul.mubr.msk.f32.vlgmr.msra.gmra.mrb[10].mxu1 %vm691_vm2, %v1933_v60 }
 0x4c0   : > { %1783 = vmatpush3.msra.mxu1 %v1301_v10  ;;  %1297 = vadd.xlane.f32.xlu0 %v1296_v11 }
 0x4c1   : > { %1784 = vmatprep.mubr.msk.f32.mxu1 %vm2238_vm0, %v2239_v1  ;;  %v1817_v1 = vpack.c.bf16 %v1386_v20, %v1385_v19 }
 0x4c3   : > { %1785 = vmatmul.mubr.msk.f32.vlgmr.msra.gmra.mrb[12].mxu1 %vm691_vm2, %v1937_v9  ;;  %1818 = vmatpush3.bf16.msra.mxu0 %v1817_v1 }
 0x4c4   : > { %775 = vadd.xlane.f32.xlu0 %v774_v12  ;;  %1819 = vmatprep.subr.bf16.mxu0 %v2237_v0 }
 0x4c7   : > { %1821 = vmatpush3.bf16.msra.mxu0 %v1820_v25 }
 0x4e0   : > { %v1121_v18 = vpop.xlane.xlu1 %1120 }
 0x549   : > { %v944_v13 = vpop.xlane.xlu0 %943 }
 0x54d   : > { %v1298_v14 = vpop.xlane.xlu0 %1297 }
 0x551   : > { %v776_v15 = vpop.xlane.xlu0 %775 }
 0x552   : > { %1938 = vrcp.f32 %v776_v15 }
 0x553   : > { %1940 = vrcp.f32 %v944_v13 }
 0x554   : > { %1942 = vrcp.f32 %v1121_v18 }
 0x555   : > { %1944 = vrcp.f32 %v1298_v14 }
 0x55c   : > { %v1939_v16 = vpop.eup %1938 }
 0x55d   : > { %v851_v17 = vmul.f32 %v1939_v16, %v846_v54  ;;  %v1941_v23 = vpop.eup %1940 }
 0x55e   : > { %v1943_v28 = vpop.eup %1942 }
 0x55f   : > { %852 = vst.msk [vmem:[#allocation5] sm:$0xff] %vm691_vm2, %v851_v17  ;;  %v1945_v32 = vpop.eup %1944 }
 0x58e   : > { %v1018_v24 = vpop.f32.mrb[8].mxu1 }
 0x58f   : > { %v1023_v26 = vmul.f32 %v1941_v23, %v1018_v24  ;;  %v1766_v27 = vpop.f32.mrb[9].mxu1 }
 0x591   : > { %1025 = vrot.lane.b32.xlu1 %v1023_v26, %s2243_s13 }
 0x592   : > { %v1195_v29 = vpop.f32.mrb[10].mxu1 }
 0x593   : > { %v1200_v30 = vmul.f32 %v1943_v28, %v1195_v29  ;;  %v1776_v31 = vpop.f32.mrb[11].mxu1 }
 0x595   : > { %1202 = vrot.lane.b32.xlu0 %v1200_v30, %s2244_s1 }
 0x596   : > { %v1372_v33 = vpop.f32.mrb[12].mxu1 }
 0x597   : > { %v1377_v34 = vmul.f32 %v1945_v32, %v1372_v33  ;;  %v1786_v35 = vpop.f32.mrb[13].mxu1 }
 0x599   : > { %1379 = vrot.lane.b32.xlu1 %v1377_v34, %s2245_s25 }
 0x603   : > { %v1026_v36 = vpop.permute.xlu1 %1025 }
 0x604   : > { %1029 = vst.msk [vmem:[#allocation5] sm:$0xff] %vm1028_vm3, %v1026_v36 }
 0x607   : > { %v1203_v0 = vpop.permute.xlu0 %1202 }
 0x608   : > { %1206 = vst.msk [vmem:[#allocation5] sm:$0xff] %vm1205_vm4, %v1203_v0 }
 0x60b   : > { %v1380_v37 = vpop.permute.xlu1 %1379 }
 0x60c   : > { %1383 = vst.msk [vmem:[#allocation5] sm:$0xff] %vm1382_vm5, %v1380_v37 }
 0x613   : > { %v1384_v38 = vld [vmem:[#allocation5] sm:$0xff] }
 0x614   : > { %1796 = vmatmul.mubr.msk.f32.vlgmr.msra.gmra.mrb[8].mxu0 %vm455_vm1, %v1384_v38 }
 0x6e7   : > { %v1465_v40 = vpop.f32.mrb[8].mxu0 }
 0x6e8   : > { %v1466_v41 = vadd.f32 %v1672_v39, %v1465_v40  ;;  %v1797_v42 = vpop.f32.mrb[9].mxu0 }
 0x6ea   : > { %1469 = vst.msk [vmem:[%s449_s18] sm:$0xff] %vm455_vm1, %v1466_v41 }
 0x6eb   : > { %2161 = shalt.err (!%p2158_p4)
}
 0x6ec   : > { %s2162_s17 = scalar_lea.hbm %s2689_s8, 128  ;;  %s2166_s20 = scalar_lea.hbm %s2802_s5, 256 }
 0x6ed   : > { %p2163_p10 = scmp.ne.s32.totalorder %s2689_s8, %s2162_s17  ;;  %p2167_p12 = scmp.lt.u32.totalorder %s2689_s8, %s2802_s5 }
 0x6ee   : > { %p2168_p0 = scmp.lt.u32.totalorder %s2166_s20, %s2162_s17  ;;  %p2170_p9 = scmp.lt.u32.totalorder %s2162_s17, %s2689_s8 }
 0x6ef   : > { %p2164_p3 = pnand %p2163_p10, %p2803_p13 }
 0x6f0   : > { %p2169_p7 = por %p2168_p0, %p2167_p12 }
 0x6f1   : > { %p2165_p8 = pneg %p2164_p3 }
 0x6f2   : > { %p2171_p11 = por %p2170_p9, %p2169_p7 }
 0x6f4   : > { %p2172_p1 = pnand %p2171_p11, %p2165_p8 }
 0x6f6   : > { %2175 = shalt.err (!%p2172_p1)
}
 0x6f7   : > { %1844 = dma.vmem_to_hbm [thread:$0]  (%p2803_p13), %s2691_s10, 128, %s2689_s8, %s1471_s27  }
 0x6f8 PF: > { %s2804_s13 = sld [smem:[#allocation24_spill]]  ;;  %s2805_s1 = sld [smem:[#allocation28_spill]] }
 0x6f9   : > { %s2806_s25 = sld [smem:[#allocation25_spill]] }
 0x6fe   : > { %s1496_s3 = sand.u32 1, %s2804_s13   ;;  %p2807_p6 = scmp.ne.s32.totalorder %s2805_s1, 0 }
 0x6ff   : > { %p2808_p5 = scmp.ge.s32.totalorder %s2806_s25, 2  ;;  %s1497_s14 = scalar_lea.sflag [#allocation8], %s1496_s3 }
 0x701   : > { %p1870_p2 = pnand %p2808_p5, %p2807_p6 }
 0x703   : > { %2209 = dma.done.wait (!%p1870_p2), %s1497_s14, 128  }
 0x704   : > { %2211 = vsyncadd (!%p1870_p2), %s1497_s14, 4294967168  ;;  %s2809_s30 = sld [smem:[#allocation26_spill]]  ;;  %s2810_s26 = sld [smem:[#allocation27_spill]] }
 0x705   : > { %s2811_s27 = smov %s2218_s28  ;;  %s2812_s28 = smov %s2222_s29 }
 0x70a   : > { %p26_p4 = scmp.ge.s32.totalorder %s2809_s30, 4   ;;  %s2813_s29 = smov %s2810_s26 }
 0x70c   :  { %28 = sbr.rel (!%p26_p4) target bundleno = 15 (0xf), region = 137 }
 0x713   :  { %1502 = vsyncpa [#allocation7], 1 }
 0x714   :  { %1504 = vsyncpa [#allocation7 + $0x1], 1 }
 0x715   :  { %1505 = vsyncpa [#allocation10], 1 }
 0x716   :  { %1507 = vsyncpa [#allocation10 + $0x1], 1 }
 0x717   :  { %1508 = vsyncpa [#allocation13], 1 }
 0x718   :  { %1509 = vsyncpa [#allocation16], 1 }
 0x719   :  { %1510 = vsyncpa [#allocation8], 1 }
 0x71a   :  { %1512 = vsyncpa [#allocation8 + $0x1], 1 }

</bundles_post_ra>
